<compile_context>
chip_gen: v7x
topology: tpu7x:2x2x1
jax: 0.10.0
libtpu: 0.0.40
codegen_flags: <defaults>
</compile_context>

<pallas_src>
import functools

import jax
import jax.numpy as jnp
from jax.experimental import pallas as pl
from jax.experimental.pallas import tpu as pltpu

DEFAULT_THRESHOLD = 0.005
MASK_SCALE = 0.01

_FALLBACK_VMEM_BYTES = 64 * 1024 * 1024     # v7x per-core VMEM (smallest generation)
_VMEM_FRACTION = 0.70                       # leave headroom for Mosaic internals


def _round_up(v, m):
    return ((v + m - 1) // m) * m


def _vmem_budget_bytes():
    """Generation-aware VMEM budget (v5e/v6e: 128 MiB, v7x: 64 MiB per core)."""
    try:
        cap = int(pltpu.get_tpu_info().vmem_capacity_bytes)
    except Exception:
        cap = _FALLBACK_VMEM_BYTES
    return int(cap * _VMEM_FRACTION)


def _padded_tile_bytes(rows, cols, itemsize=4):
    # f32 VMEM tiles are (8, 128); account for layout padding of small dims.
    return _round_up(max(rows, 1), 8) * _round_up(max(cols, 1), 128) * itemsize


def _step_vmem_bytes(to, c, khkw, wx, ohw):
    """Approximate per-grid-step VMEM footprint (f32), incl. double buffering."""
    x_blk = _padded_tile_bytes(c, wx)
    w_blk = khkw * _padded_tile_bytes(to, c)
    o_blk = _padded_tile_bytes(to, ohw)
    # 2x: Pallas double-buffers every BlockSpec operand by default (review fix);
    # + temporaries: f32 accumulator, one dot result, one shifted x window.
    return 2 * (x_blk + w_blk + o_blk) + 2 * o_blk + x_blk


def _choose_output_tile(o, c, khkw, wx, ohw, budget):
    """Largest output-channel tile (<=256, multiple of 8) within the VMEM budget."""
    to = min(256, _round_up(o, 8))
    while to > 8 and _step_vmem_bytes(to, c, khkw, wx, ohw) > budget:
        to -= 8
    return to


# ----------------------------------------------------------------------------
# Pallas kernel: one grid step = one padded image x one output-channel tile.
#   w_ref:   (KH*KW, TO, C)  masked weight, one (TO, C) matrix per filter tap
#   x_ref:   (C, Wx)         flattened zero-padded image, Wx = Hp*Wp + KW - 1
#   out_ref: (TO, OHf*Wp)    dense stride-1 correlation, row-major over (OHf, Wp)
# ----------------------------------------------------------------------------
def masked_conv_kernel(w_ref, x_ref, out_ref, *, kh, kw, wp, ohw):
    acc = jnp.zeros(out_ref.shape, jnp.float32)
    for i in range(kh):
        for j in range(kw):
            off = i * wp + j                      # static lane offset of tap (i, j)
            acc += jnp.dot(
                w_ref[i * kw + j],                # (TO, C)
                x_ref[:, pl.ds(off, ohw)],        # (C, OHf*Wp) shifted view (fused im2col)
                preferred_element_type=jnp.float32,
            )
    out_ref[...] = acc.astype(out_ref.dtype)


@functools.partial(jax.jit, static_argnames=("stride", "padding"))
def masked_conv2d(x, weight, mask_real, threshold, *, stride=1, padding=0):
    """Forward pass of MaskedConv2d (bias=False, as in the module's default).

    x:         (N, C, H, W)    float32
    weight:    (O, C, KH, KW)  float32
    mask_real: (O, C, KH, KW)  float32
    threshold: (1,)            float32
    returns:   (N, O, OH, OW)  float32
    """
    n, c, h, w = x.shape
    o, _, kh, kw = weight.shape

    hp, wp = h + 2 * padding, w + 2 * padding
    oh = (hp - kh) // stride + 1
    ow = (wp - kw) // stride + 1
    ohf = hp - kh + 1            # dense (stride-1) correlation rows computed in-kernel
    ohw = ohf * wp               # flat per-step output width (lane dim)
    wx = hp * wp + (kw - 1)      # flat input width (+KW-1 zeros keeps every tap window in-bounds)
    khkw = kh * kw

    # --- Binarizer + weight masking: one fused XLA compare+select, done once. ---
    mw = jnp.where(mask_real > threshold[0], weight, jnp.zeros_like(weight))
    # (O, C, KH, KW) -> (KH*KW, O, C): one tiny host-side transpose of the weight
    # so the kernel grabs the (TO, C) matrix of tap (i, j) with a static index.
    w_k = jnp.transpose(mw, (2, 3, 0, 1)).reshape(khkw, o, c)

    # --- Output-channel tiling, VMEM-budgeted per TPU generation. ---
    budget = _vmem_budget_bytes()
    to = _choose_output_tile(o, c, khkw, wx, ohw, budget)
    o_pad = _round_up(o, to)
    if o_pad != o:
        w_k = jnp.pad(w_k, ((0, 0), (0, o_pad - o), (0, 0)))

    # --- Fused-im2col input: zero-pad spatially, flatten (Hp, Wp) -> Hp*Wp. ---
    xp = jnp.pad(x, ((0, 0), (0, 0), (padding, padding), (padding, padding)))
    xf = jnp.pad(xp.reshape(n, c, hp * wp), ((0, 0), (0, 0), (0, kw - 1)))

    kernel = functools.partial(masked_conv_kernel, kh=kh, kw=kw, wp=wp, ohw=ohw)

    out = pl.pallas_call(
        kernel,
        out_shape=jax.ShapeDtypeStruct((n, o_pad, ohw), jnp.float32),
        grid_spec=pltpu.PrefetchScalarGridSpec(
            num_scalar_prefetch=0,
            grid=(n, o_pad // to),               # (batch, output-channel tiles)
            in_specs=[
                pl.BlockSpec((khkw, to, c), lambda b, ob: (0, ob, 0)),   # masked weight tile
                pl.BlockSpec((None, c, wx), lambda b, ob: (b, 0, 0)),    # one flat image
            ],
            out_specs=pl.BlockSpec((None, to, ohw), lambda b, ob: (b, ob, 0)),
        ),
        compiler_params=pltpu.CompilerParams(
            dimension_semantics=("parallel", "parallel"),
            vmem_limit_bytes=budget,
        ),
    )(w_k, xf)

    # --- Host-side epilogue: drop padded channels, un-flatten, apply stride. ---
    y = out[:, :o, :].reshape(n, o, ohf, wp)
    y = y[:, :, ::stride, ::stride][:, :, :oh, :ow]
    return y


def reference_masked_conv2d(x, weight, mask_real, threshold, *, stride, padding):
    mask = (mask_real > threshold[0]).astype(weight.dtype)
    mw = weight * mask
    return jax.lax.conv_general_dilated(
        x, mw,
        window_strides=(stride, stride),
        padding=[(padding, padding), (padding, padding)],
        dimension_numbers=("NCHW", "OIHW", "NCHW"),
    )


if __name__ == "__main__":
    # Small config consistent with MaskedConv2d(in_channels=4, out_channels=8,
    # kernel_size=3, stride=1, padding=1, bias=False).
    N, Cin, H, W = 2, 4, 16, 16
    Cout, KH, KW = 8, 3, 3
    stride, padding = 1, 1

    key = jax.random.PRNGKey(0)
    kx, kw_, km, kt = jax.random.split(key, 4)

    def _snap_bf16(a):
        # Snap test data to the bf16 grid so MXU input rounding is exact and the
        # f32 comparison below is independent of the default matmul pass count.
        return a.astype(jnp.bfloat16).astype(jnp.float32)

    x = _snap_bf16(jax.random.normal(kx, (N, Cin, H, W), dtype=jnp.float32))
    # Deterministic synthetic parameter init (shapes / scales from __init__):
    weight = _snap_bf16(
        jax.random.normal(kw_, (Cout, Cin, KH, KW), dtype=jnp.float32) * 0.1
    )
    mask_real = (
        jax.random.uniform(km, (Cout, Cin, KH, KW),
                           minval=-MASK_SCALE, maxval=MASK_SCALE)
        + DEFAULT_THRESHOLD
    ).astype(jnp.float32)
    threshold = jax.random.uniform(
        kt, (1,), minval=-DEFAULT_THRESHOLD, maxval=DEFAULT_THRESHOLD
    ).astype(jnp.float32)

    y = masked_conv2d(x, weight, mask_real, threshold, stride=stride, padding=padding)
    y = jax.block_until_ready(y)

    y_ref = reference_masked_conv2d(
        x, weight, mask_real, threshold, stride=stride, padding=padding
    )
    assert y.shape == (N, Cout, H, W), y.shape
    assert jnp.allclose(y, y_ref, atol=1e-4, rtol=1e-4), "mismatch vs reference"

    print("KERNEL_OK")
</pallas_src>

<mosaic_0001>
module attributes {stable_mosaic.version = 11 : i64} {
  func.func @masked_conv_kernel(%arg0: i32, %arg1: i32, %arg2: memref<9x8x4xf32, #tpu.memory_space<vmem>>, %arg3: memref<1x4x326xf32, #tpu.memory_space<vmem>>, %arg4: memref<1x8x288xf32, #tpu.memory_space<vmem>>) attributes {dimension_semantics = [#tpu.dimension_semantics<parallel>, #tpu.dimension_semantics<parallel>], iteration_bounds = array<i64: 2, 1>, scalar_prefetch = 0 : i64, scratch_operands = 0 : i64, tpu.core_type = #tpu.core_type<tc>, window_params = [{transform_indices = @transform_0, window_bounds = array<i64: 9, 8, 4>}, {transform_indices = @transform_1, window_bounds = array<i64: 1, 4, 326>}, {transform_indices = @transform_2, window_bounds = array<i64: 1, 8, 288>}]} {
    %cst = arith.constant 0.000000e+00 : f32
    %0 = vector.broadcast %cst : f32 to vector<8x288xf32>
    %c0 = arith.constant 0 : index
    %c0_0 = arith.constant 0 : index
    %c0_1 = arith.constant 0 : index
    %1 = vector.load %arg2[%c0, %c0_0, %c0_1] : memref<9x8x4xf32, #tpu.memory_space<vmem>>, vector<1x8x4xf32>
    %2 = vector.shape_cast %1 : vector<1x8x4xf32> to vector<8x4xf32>
    %c0_2 = arith.constant 0 : index
    %c0_3 = arith.constant 0 : index
    %c0_4 = arith.constant 0 : index
    %3 = vector.load %arg3[%c0_2, %c0_3, %c0_4] : memref<1x4x326xf32, #tpu.memory_space<vmem>>, vector<1x4x288xf32>
    %4 = vector.shape_cast %3 : vector<1x4x288xf32> to vector<4x288xf32>
    %cst_5 = arith.constant dense<0.000000e+00> : vector<8x288xf32>
    %5 = tpu.matmul %2, %4, %cst_5 {dimension_numbers = #tpu.dot_dimension_numbers<[1], [0], [0], [1], [0, 0, 1, 1], [], []>} : vector<8x4xf32>, vector<4x288xf32>, vector<8x288xf32> -> vector<8x288xf32>
    %6 = arith.addf %0, %5 : vector<8x288xf32>
    %c1 = arith.constant 1 : index
    %c0_6 = arith.constant 0 : index
    %c0_7 = arith.constant 0 : index
    %7 = vector.load %arg2[%c1, %c0_6, %c0_7] : memref<9x8x4xf32, #tpu.memory_space<vmem>>, vector<1x8x4xf32>
    %8 = vector.shape_cast %7 : vector<1x8x4xf32> to vector<8x4xf32>
    %c0_8 = arith.constant 0 : index
    %c0_9 = arith.constant 0 : index
    %c1_10 = arith.constant 1 : index
    %9 = vector.load %arg3[%c0_8, %c0_9, %c1_10] : memref<1x4x326xf32, #tpu.memory_space<vmem>>, vector<1x4x288xf32>
    %10 = vector.shape_cast %9 : vector<1x4x288xf32> to vector<4x288xf32>
    %cst_11 = arith.constant dense<0.000000e+00> : vector<8x288xf32>
    %11 = tpu.matmul %8, %10, %cst_11 {dimension_numbers = #tpu.dot_dimension_numbers<[1], [0], [0], [1], [0, 0, 1, 1], [], []>} : vector<8x4xf32>, vector<4x288xf32>, vector<8x288xf32> -> vector<8x288xf32>
    %12 = arith.addf %6, %11 : vector<8x288xf32>
    %c2 = arith.constant 2 : index
    %c0_12 = arith.constant 0 : index
    %c0_13 = arith.constant 0 : index
    %13 = vector.load %arg2[%c2, %c0_12, %c0_13] : memref<9x8x4xf32, #tpu.memory_space<vmem>>, vector<1x8x4xf32>
    %14 = vector.shape_cast %13 : vector<1x8x4xf32> to vector<8x4xf32>
    %c0_14 = arith.constant 0 : index
    %c0_15 = arith.constant 0 : index
    %c2_16 = arith.constant 2 : index
    %15 = vector.load %arg3[%c0_14, %c0_15, %c2_16] : memref<1x4x326xf32, #tpu.memory_space<vmem>>, vector<1x4x288xf32>
    %16 = vector.shape_cast %15 : vector<1x4x288xf32> to vector<4x288xf32>
    %cst_17 = arith.constant dense<0.000000e+00> : vector<8x288xf32>
    %17 = tpu.matmul %14, %16, %cst_17 {dimension_numbers = #tpu.dot_dimension_numbers<[1], [0], [0], [1], [0, 0, 1, 1], [], []>} : vector<8x4xf32>, vector<4x288xf32>, vector<8x288xf32> -> vector<8x288xf32>
    %18 = arith.addf %12, %17 : vector<8x288xf32>
    %c3 = arith.constant 3 : index
    %c0_18 = arith.constant 0 : index
    %c0_19 = arith.constant 0 : index
    %19 = vector.load %arg2[%c3, %c0_18, %c0_19] : memref<9x8x4xf32, #tpu.memory_space<vmem>>, vector<1x8x4xf32>
    %20 = vector.shape_cast %19 : vector<1x8x4xf32> to vector<8x4xf32>
    %c0_20 = arith.constant 0 : index
    %c0_21 = arith.constant 0 : index
    %c18 = arith.constant 18 : index
    %21 = vector.load %arg3[%c0_20, %c0_21, %c18] : memref<1x4x326xf32, #tpu.memory_space<vmem>>, vector<1x4x288xf32>
    %22 = vector.shape_cast %21 : vector<1x4x288xf32> to vector<4x288xf32>
    %cst_22 = arith.constant dense<0.000000e+00> : vector<8x288xf32>
    %23 = tpu.matmul %20, %22, %cst_22 {dimension_numbers = #tpu.dot_dimension_numbers<[1], [0], [0], [1], [0, 0, 1, 1], [], []>} : vector<8x4xf32>, vector<4x288xf32>, vector<8x288xf32> -> vector<8x288xf32>
    %24 = arith.addf %18, %23 : vector<8x288xf32>
    %c4 = arith.constant 4 : index
    %c0_23 = arith.constant 0 : index
    %c0_24 = arith.constant 0 : index
    %25 = vector.load %arg2[%c4, %c0_23, %c0_24] : memref<9x8x4xf32, #tpu.memory_space<vmem>>, vector<1x8x4xf32>
    %26 = vector.shape_cast %25 : vector<1x8x4xf32> to vector<8x4xf32>
    %c0_25 = arith.constant 0 : index
    %c0_26 = arith.constant 0 : index
    %c19 = arith.constant 19 : index
    %27 = vector.load %arg3[%c0_25, %c0_26, %c19] : memref<1x4x326xf32, #tpu.memory_space<vmem>>, vector<1x4x288xf32>
    %28 = vector.shape_cast %27 : vector<1x4x288xf32> to vector<4x288xf32>
    %cst_27 = arith.constant dense<0.000000e+00> : vector<8x288xf32>
    %29 = tpu.matmul %26, %28, %cst_27 {dimension_numbers = #tpu.dot_dimension_numbers<[1], [0], [0], [1], [0, 0, 1, 1], [], []>} : vector<8x4xf32>, vector<4x288xf32>, vector<8x288xf32> -> vector<8x288xf32>
    %30 = arith.addf %24, %29 : vector<8x288xf32>
    %c5 = arith.constant 5 : index
    %c0_28 = arith.constant 0 : index
    %c0_29 = arith.constant 0 : index
    %31 = vector.load %arg2[%c5, %c0_28, %c0_29] : memref<9x8x4xf32, #tpu.memory_space<vmem>>, vector<1x8x4xf32>
    %32 = vector.shape_cast %31 : vector<1x8x4xf32> to vector<8x4xf32>
    %c0_30 = arith.constant 0 : index
    %c0_31 = arith.constant 0 : index
    %c20 = arith.constant 20 : index
    %33 = vector.load %arg3[%c0_30, %c0_31, %c20] : memref<1x4x326xf32, #tpu.memory_space<vmem>>, vector<1x4x288xf32>
    %34 = vector.shape_cast %33 : vector<1x4x288xf32> to vector<4x288xf32>
    %cst_32 = arith.constant dense<0.000000e+00> : vector<8x288xf32>
    %35 = tpu.matmul %32, %34, %cst_32 {dimension_numbers = #tpu.dot_dimension_numbers<[1], [0], [0], [1], [0, 0, 1, 1], [], []>} : vector<8x4xf32>, vector<4x288xf32>, vector<8x288xf32> -> vector<8x288xf32>
    %36 = arith.addf %30, %35 : vector<8x288xf32>
    %c6 = arith.constant 6 : index
    %c0_33 = arith.constant 0 : index
    %c0_34 = arith.constant 0 : index
    %37 = vector.load %arg2[%c6, %c0_33, %c0_34] : memref<9x8x4xf32, #tpu.memory_space<vmem>>, vector<1x8x4xf32>
    %38 = vector.shape_cast %37 : vector<1x8x4xf32> to vector<8x4xf32>
    %c0_35 = arith.constant 0 : index
    %c0_36 = arith.constant 0 : index
    %c36 = arith.constant 36 : index
    %39 = vector.load %arg3[%c0_35, %c0_36, %c36] : memref<1x4x326xf32, #tpu.memory_space<vmem>>, vector<1x4x288xf32>
    %40 = vector.shape_cast %39 : vector<1x4x288xf32> to vector<4x288xf32>
    %cst_37 = arith.constant dense<0.000000e+00> : vector<8x288xf32>
    %41 = tpu.matmul %38, %40, %cst_37 {dimension_numbers = #tpu.dot_dimension_numbers<[1], [0], [0], [1], [0, 0, 1, 1], [], []>} : vector<8x4xf32>, vector<4x288xf32>, vector<8x288xf32> -> vector<8x288xf32>
    %42 = arith.addf %36, %41 : vector<8x288xf32>
    %c7 = arith.constant 7 : index
    %c0_38 = arith.constant 0 : index
    %c0_39 = arith.constant 0 : index
    %43 = vector.load %arg2[%c7, %c0_38, %c0_39] : memref<9x8x4xf32, #tpu.memory_space<vmem>>, vector<1x8x4xf32>
    %44 = vector.shape_cast %43 : vector<1x8x4xf32> to vector<8x4xf32>
    %c0_40 = arith.constant 0 : index
    %c0_41 = arith.constant 0 : index
    %c37 = arith.constant 37 : index
    %45 = vector.load %arg3[%c0_40, %c0_41, %c37] : memref<1x4x326xf32, #tpu.memory_space<vmem>>, vector<1x4x288xf32>
    %46 = vector.shape_cast %45 : vector<1x4x288xf32> to vector<4x288xf32>
    %cst_42 = arith.constant dense<0.000000e+00> : vector<8x288xf32>
    %47 = tpu.matmul %44, %46, %cst_42 {dimension_numbers = #tpu.dot_dimension_numbers<[1], [0], [0], [1], [0, 0, 1, 1], [], []>} : vector<8x4xf32>, vector<4x288xf32>, vector<8x288xf32> -> vector<8x288xf32>
    %48 = arith.addf %42, %47 : vector<8x288xf32>
    %c8 = arith.constant 8 : index
    %c0_43 = arith.constant 0 : index
    %c0_44 = arith.constant 0 : index
    %49 = vector.load %arg2[%c8, %c0_43, %c0_44] : memref<9x8x4xf32, #tpu.memory_space<vmem>>, vector<1x8x4xf32>
    %50 = vector.shape_cast %49 : vector<1x8x4xf32> to vector<8x4xf32>
    %c0_45 = arith.constant 0 : index
    %c0_46 = arith.constant 0 : index
    %c38 = arith.constant 38 : index
    %51 = vector.load %arg3[%c0_45, %c0_46, %c38] : memref<1x4x326xf32, #tpu.memory_space<vmem>>, vector<1x4x288xf32>
    %52 = vector.shape_cast %51 : vector<1x4x288xf32> to vector<4x288xf32>
    %cst_47 = arith.constant dense<0.000000e+00> : vector<8x288xf32>
    %53 = tpu.matmul %50, %52, %cst_47 {dimension_numbers = #tpu.dot_dimension_numbers<[1], [0], [0], [1], [0, 0, 1, 1], [], []>} : vector<8x4xf32>, vector<4x288xf32>, vector<8x288xf32> -> vector<8x288xf32>
    %54 = arith.addf %48, %53 : vector<8x288xf32>
    %c0_48 = arith.constant 0 : index
    %c0_49 = arith.constant 0 : index
    %c0_50 = arith.constant 0 : index
    %55 = vector.load %arg4[%c0_48, %c0_49, %c0_50] : memref<1x8x288xf32, #tpu.memory_space<vmem>>, vector<1x8x288xf32>
    %56 = vector.shape_cast %55 : vector<1x8x288xf32> to vector<8x288xf32>
    %57 = vector.shape_cast %54 : vector<8x288xf32> to vector<1x8x288xf32>
    tpu.vector_store %arg4[%c0_48, %c0_49, %c0_50], %57 {strides = array<i32>} : memref<1x8x288xf32, #tpu.memory_space<vmem>>, vector<1x8x288xf32>,
    return
  }
  func.func @transform_0(%arg0: i32, %arg1: i32) -> (i32, i32, i32) {
    %c0_i32 = arith.constant 0 : i32
    %c0_i32_0 = arith.constant 0 : i32
    %c0_i32_1 = arith.constant 0 : i32
    return %c0_i32, %arg1, %c0_i32_0 : i32, i32, i32
  }
  func.func @transform_1(%arg0: i32, %arg1: i32) -> (i32, i32, i32) {
    %c0_i32 = arith.constant 0 : i32
    %c0_i32_0 = arith.constant 0 : i32
    %c0_i32_1 = arith.constant 0 : i32
    return %arg0, %c0_i32, %c0_i32_0 : i32, i32, i32
  }
  func.func @transform_2(%arg0: i32, %arg1: i32) -> (i32, i32, i32) {
    %c0_i32 = arith.constant 0 : i32
    %c0_i32_0 = arith.constant 0 : i32
    return %arg0, %arg1, %c0_i32 : i32, i32, i32
  }
}

</mosaic_0001>

<bundles_post_ra>
// kernel: masked_conv2d.1
= control target key start
LH: loop header
LB: loop body
LE: loop exit
PB: predicated region body
PF: predicated region fallthrough
CT: control target
= control target key end

     0   :  { %s2032_s9 = smov 0   ;;  %s2034_s10 = smov 0   ;;  %s2200_s0 = inlined_call_operand.vmem [shape: f32[9,8,4], index: 0, kind: input, shape index: {}]   ;;  %s2201_s1 = inlined_call_operand.vmem [shape: f32[2,4,326], index: 1, kind: input, shape index: {}]   ;;  %s2202_s2 = inlined_call_operand.vmem [shape: f32[2,8,288], index: 2, kind: output, shape index: {}]  }
   0x1   :  { %s2036_s11 = smov 0  }
   0x2 LB: > { %s24_s12 = sadd.s32 1, %s2001_s10  ;;  %p1793_p0 = scmp.ge.s32.totalorder %s2005_s11, 1  ;;  %s2005_s11 = sphi %s2036_s11, %s12_s11   ;;  %s2001_s10 = sphi %s2034_s10, %s2204_s10   ;;  %s1997_s9 = sphi %s2032_s9, %s2203_s9  }
   0x3   : > { %p26_p1 = scmp.ge.s32.totalorder %s24_s12, 2  ;;  %p135_p2 = scmp.lt.s32.totalorder %s2005_s11, 3 }
   0x5   : > { %s2206_s12 = smov (%p26_p1, %s24_s12), 0  ;;  %p136_p3 = pnand %p1793_p0, %p135_p2 }
   0x6   : > { %p169_p4 = scmp.lt.s32.totalorder (!%p136_p3), %s1997_s9, 1  ;;  %v2007_v0 = vmov (!%p136_p3), 0.0   ;;  %vm2008_vm0 = vmmov (!%p136_p3), 0   ;;  %s2009_s17 = smov (!%p136_p3), 127   ;;  %vm204_vm1 = vcmask (!%p136_p3), 1043456   ;;  %vm197_vm2 = vcmask (!%p136_p3), 1039360  }
   0x7   : > { %139 = sbr.rel (%p136_p3) target bundleno = 421 (0x1a5), region = 28  ;;  %1869 = vmatprep.subr.mxu1 (!%p136_p3), %v2007_v0  ;;  %1871 = vmatprep.mubr.msk.f32.mxu1 (!%p136_p3), %vm2008_vm0, %v2007_v0  ;;  %s2010_s18 = smov (!%p136_p3), 126   ;;  %v1796_v14 = vld [vmem:[%s2200_s0 + $0x8] sm:$0xff] (!%p136_p3)  ;;  %vm200_vm3 = vcmask (!%p136_p3), 31744   ;;  %vm515_vm4 = vcmask (!%p136_p3), 1031168   ;;  %v183_v21 = vld [vmem:[%s2200_s0] sm:$0xff] (!%p136_p3) }
   0x8   : > { %275 = vmatprep.mubr.f32.mxu0 (!%p136_p3), %v2007_v0  ;;  %s2011_s19 = smov (!%p136_p3), 110   ;;  %s2012_s20 = smov (!%p136_p3), 109   ;;  %vm684_vm5 = vcmask (!%p136_p3), 900096   ;;  %v1807_v28 = vld [vmem:[%s2200_s0 + $0x10] sm:$0xff] (!%p136_p3)  ;;  %vm853_vm6 = vcmask (!%p136_p3), 891904   ;;  %v1813_v34 = vld [vmem:[%s2200_s0 + $0x18] sm:$0xff] (!%p136_p3) }
   0x9   : > { %s2013_s21 = smov (!%p136_p3), 108   ;;  %s2014_s22 = smov (!%p136_p3), 92   ;;  %vm1022_vm7 = vcmask (!%p136_p3), 883712   ;;  %v1819_v40 = vld [vmem:[%s2200_s0 + $0x20] sm:$0xff] (!%p136_p3)  ;;  %vm1191_vm8 = vcmask (!%p136_p3), 752640   ;;  %v1825_v46 = vld [vmem:[%s2200_s0 + $0x28] sm:$0xff] (!%p136_p3) }
   0xa   : > { %s2015_s23 = smov (!%p136_p3), 91   ;;  %s2016_s24 = smov (!%p136_p3), 90   ;;  %vm1360_vm9 = vcmask (!%p136_p3), 744448   ;;  %v1831_v51 = vld [vmem:[%s2200_s0 + $0x30] sm:$0xff] (!%p136_p3)  ;;  %vm1529_vm10 = vcmask (!%p136_p3), 736256   ;;  %v1837_v57 = vld [vmem:[%s2200_s0 + $0x38] sm:$0xff] (!%p136_p3) }
   0xb   : > { %v1843_v59 = vld [vmem:[%s2200_s0 + $0x40] sm:$0xff] (!%p136_p3)  ;;  %vm1687_vm11 = vcmask (!%p136_p3), 261120  }
   0xe   : > { %s2208_s9 = smov (!%p169_p4, %s1997_s9), 1 }
   0xf   : > { %s1946_s13 = smul.u32 12, %s2208_s9 }
  0x11   : > { %s2060_s16 = scalar_lea.vmem %s2201_s1, %s1946_s13 }
  0x12   : > { %v184_v1 = vld [vmem:[%s2060_s16] sm:$0xff]  ;;  %v185_v3 = vld [vmem:[%s2060_s16 + $0x8] sm:$0xf] }
  0x13   : > { %191 = vrot.lane.b32.xlu1 %v184_v1, %s2009_s17  ;;  %v190_v2 = vcombine.high %v184_v1, %v184_v1  ;;  %v505_v4 = vld [vmem:[%s2060_s16 + $0x8] sm:$0xf] }
  0x14   : > { %v674_v5 = vld [vmem:[%s2060_s16 + $0x8] sm:$0xf] }
  0x15   : > { %193 = vrot.lane.b32.xlu0 %v190_v2, %s2009_s17  ;;  %v843_v6 = vld [vmem:[%s2060_s16 + $0x8] sm:$0xf] }
  0x16   : > { %v1012_v7 = vld [vmem:[%s2060_s16 + $0x8] sm:$0xf] }
  0x17   : > { %511 = vrot.lane.b32.xlu1 %v190_v2, %s2010_s18  ;;  %v1181_v8 = vld [vmem:[%s2060_s16 + $0x8] sm:$0xf] }
  0x18   : > { %v1350_v9 = vld [vmem:[%s2060_s16 + $0x8] sm:$0xf] }
  0x19   : > { %195 = vrot.lane.b32.xlu0 %v185_v3, %s2009_s17  ;;  %v1519_v10 = vld [vmem:[%s2060_s16 + $0x8] sm:$0xf] }
  0x1b   : > { %509 = vrot.lane.b32.xlu1 %v184_v1, %s2010_s18 }
  0x1d   : > { %513 = vrot.lane.b32.xlu0 %v505_v4, %s2010_s18 }
  0x1f   : > { %682 = vrot.lane.b32.xlu1 %v674_v5, %s2011_s19 }
  0x21   : > { %680 = vrot.lane.b32.xlu0 %v190_v2, %s2011_s19 }
  0x23   : > { %849 = vrot.lane.b32.xlu1 %v190_v2, %s2012_s20 }
  0x25   : > { %678 = vrot.lane.b32.xlu0 %v184_v1, %s2011_s19  ;;  %s1947_s19 = smul.u32 24, %s2208_s9 }
  0x27   : > { %847 = vrot.lane.b32.xlu1 %v184_v1, %s2012_s20 }
  0x29   : > { %851 = vrot.lane.b32.xlu0 %v843_v6, %s2012_s20 }
  0x2b   : > { %1020 = vrot.lane.b32.xlu1 %v1012_v7, %s2013_s21 }
  0x2d   : > { %1018 = vrot.lane.b32.xlu0 %v190_v2, %s2013_s21 }
  0x2f   : > { %1187 = vrot.lane.b32.xlu1 %v190_v2, %s2014_s22 }
  0x31   : > { %1016 = vrot.lane.b32.xlu0 %v184_v1, %s2013_s21 }
  0x33   : > { %1185 = vrot.lane.b32.xlu1 %v184_v1, %s2014_s22 }
  0x35   : > { %1189 = vrot.lane.b32.xlu0 %v1181_v8, %s2014_s22  ;;  %s182_s22 = scalar_lea.vmem %s2202_s2, %s1947_s19 }
  0x37   : > { %1358 = vrot.lane.b32.xlu1 %v1350_v9, %s2015_s23 }
  0x39   : > { %1356 = vrot.lane.b32.xlu0 %v190_v2, %s2015_s23 }
  0x3b   : > { %1525 = vrot.lane.b32.xlu1 %v190_v2, %s2016_s24 }
  0x3d   : > { %1354 = vrot.lane.b32.xlu0 %v184_v1, %s2015_s23 }
  0x3f   : > { %1523 = vrot.lane.b32.xlu1 %v184_v1, %s2016_s24 }
  0x41   : > { %1527 = vrot.lane.b32.xlu0 %v1519_v10, %s2016_s24 }
  0x85   : > { %v192_v11 = vpop.permute.xlu1 %191 }
  0x87   : > { %v194_v12 = vpop.permute.xlu0 %193 }
  0x88   : > { %v198_v17 = vsel %vm197_vm2, %v192_v11, %v194_v12 }
  0x89   : > { %v512_v13 = vpop.permute.xlu1 %511 }
  0x8b   : > { %v196_v15 = vpop.permute.xlu0 %195 }
  0x8c   : > { %1870 = vmatpush3.msk.msra.mxu1 %vm204_vm1, %v196_v15  ;;  %v199_v16 = vsel %vm197_vm2, %v194_v12, %v196_v15 }
  0x8d   : > { %1797 = vmatprep.subr.msk.mxu0 %vm204_vm1, %v199_v16  ;;  %1872 = vmatmul.mubr.msk.f32.vlgmr.msra.gmra.mrb[0].mxu1 %vm200_vm3, %v1796_v14  ;;  %v510_v18 = vpop.permute.xlu1 %509 }
  0x8e   : > { %1798 = vmatpush1.msk.msra.mxu0 %vm204_vm1, %v198_v17  ;;  %1874 = vmatprep.subr.mxu1 %v2007_v0  ;;  %v516_v24 = vsel %vm515_vm4, %v510_v18, %v512_v13 }
  0x8f   : > { %1799 = vmatmul.mubr.msk.f32.vlgmr.msra.gmra.mrb[0].mxu0 %vm200_vm3, %v1796_v14  ;;  %1802 = vmatprep.subr.msk.mxu0 %vm204_vm1, %v190_v2  ;;  %v514_v19 = vpop.permute.xlu0 %513 }
  0x90   : > { %1803 = vmatpush1.msk.msra.mxu0 %vm204_vm1, %v184_v1  ;;  %1875 = vmatpush3.msk.msra.mxu1 %vm204_vm1, %v185_v3  ;;  %v517_v20 = vsel %vm515_vm4, %v512_v13, %v514_v19 }
  0x91   : > { %1876 = vmatprep.mubr.msk.f32.mxu1 %vm2008_vm0, %v2007_v0  ;;  %1808 = vmatprep.subr.msk.mxu0 %vm204_vm1, %v517_v20  ;;  %v683_v23 = vpop.permute.xlu1 %682 }
  0x92   : > { %1879 = vmatprep.subr.mxu1 %v2007_v0  ;;  %425 = vmatprep.mubr.f32.mxu0 %v2007_v0 }
  0x93   : > { %v681_v22 = vpop.permute.xlu0 %680 }
  0x94   : > { %v686_v25 = vsel %vm684_vm5, %v681_v22, %v683_v23 }
  0x95   : > { %1877 = vmatmul.mubr.msk.f32.vlgmr.msra.gmra.mrb[0].mxu1 %vm200_vm3, %v183_v21  ;;  %v850_v27 = vpop.permute.xlu1 %849 }
  0x96   : > { %1880 = vmatpush3.msk.msra.mxu1 %vm204_vm1, %v514_v19  ;;  %1881 = vmatprep.mubr.msk.f32.mxu1 %vm2008_vm0, %v2007_v0 }
  0x97   : > { %1804 = vmatmul.mubr.msk.f32.vlgmr.msra.gmra.mrb[0].mxu0 %vm200_vm3, %v183_v21  ;;  %v679_v26 = vpop.permute.xlu0 %678  ;;  %1884 = vmatprep.subr.mxu1 %v2007_v0 }
  0x98   : > { %1809 = vmatpush1.msk.msra.mxu0 %vm204_vm1, %v516_v24  ;;  %591 = vmatprep.mubr.f32.mxu0 %v2007_v0  ;;  %v685_v30 = vsel %vm684_vm5, %v679_v26, %v681_v22 }
  0x99   : > { %1814 = vmatprep.subr.msk.mxu0 %vm204_vm1, %v686_v25  ;;  %v848_v32 = vpop.permute.xlu1 %847 }
  0x9a   : > { %v854_v36 = vsel %vm853_vm6, %v848_v32, %v850_v27 }
  0x9b   : > { %v852_v29 = vpop.permute.xlu0 %851 }
  0x9c   : > { %v855_v31 = vsel %vm853_vm6, %v850_v27, %v852_v29 }
  0x9d   : > { %1882 = vmatmul.mubr.msk.f32.vlgmr.msra.gmra.mrb[0].mxu1 %vm200_vm3, %v1807_v28  ;;  %v1021_v35 = vpop.permute.xlu1 %1020 }
  0x9e   : > { %1885 = vmatpush3.msk.msra.mxu1 %vm204_vm1, %v683_v23  ;;  %1886 = vmatprep.mubr.msk.f32.mxu1 %vm2008_vm0, %v2007_v0 }
  0x9f   : > { %1810 = vmatmul.mubr.msk.f32.vlgmr.msra.gmra.mrb[0].mxu0 %vm200_vm3, %v1807_v28  ;;  %1889 = vmatprep.subr.mxu1 %v2007_v0  ;;  %v1019_v33 = vpop.permute.xlu0 %1018 }
  0xa0   : > { %1815 = vmatpush1.msk.msra.mxu0 %vm204_vm1, %v685_v30  ;;  %760 = vmatprep.mubr.f32.mxu0 %v2007_v0  ;;  %v1024_v37 = vsel %vm1022_vm7, %v1019_v33, %v1021_v35 }
  0xa1   : > { %1820 = vmatprep.subr.msk.mxu0 %vm204_vm1, %v855_v31  ;;  %v1188_v39 = vpop.permute.xlu1 %1187 }
  0xa3   : > { %v1017_v38 = vpop.permute.xlu0 %1016 }
  0xa4   : > { %v1023_v42 = vsel %vm1022_vm7, %v1017_v38, %v1019_v33 }
  0xa5   : > { %1887 = vmatmul.mubr.msk.f32.vlgmr.msra.gmra.mrb[0].mxu1 %vm200_vm3, %v1813_v34  ;;  %v1186_v44 = vpop.permute.xlu1 %1185 }
  0xa6   : > { %1890 = vmatpush3.msk.msra.mxu1 %vm204_vm1, %v852_v29  ;;  %1891 = vmatprep.mubr.msk.f32.mxu1 %vm2008_vm0, %v2007_v0  ;;  %v1192_v48 = vsel %vm1191_vm8, %v1186_v44, %v1188_v39 }
  0xa7   : > { %1816 = vmatmul.mubr.msk.f32.vlgmr.msra.gmra.mrb[0].mxu0 %vm200_vm3, %v1813_v34  ;;  %1894 = vmatprep.subr.mxu1 %v2007_v0  ;;  %v1190_v41 = vpop.permute.xlu0 %1189 }
  0xa8   : > { %1821 = vmatpush1.msk.msra.mxu0 %vm204_vm1, %v854_v36  ;;  %929 = vmatprep.mubr.f32.mxu0 %v2007_v0  ;;  %v1193_v43 = vsel %vm1191_vm8, %v1188_v39, %v1190_v41 }
  0xa9   : > { %1826 = vmatprep.subr.msk.mxu0 %vm204_vm1, %v1024_v37  ;;  %v1359_v47 = vpop.permute.xlu1 %1358 }
  0xab   : > { %v1357_v45 = vpop.permute.xlu0 %1356 }
  0xac   : > { %v1362_v49 = vsel %vm1360_vm9, %v1357_v45, %v1359_v47 }
  0xad   : > { %1892 = vmatmul.mubr.msk.f32.vlgmr.msra.gmra.mrb[0].mxu1 %vm200_vm3, %v1819_v40  ;;  %v1526_v53 = vpop.permute.xlu1 %1525 }
  0xae   : > { %1895 = vmatpush3.msk.msra.mxu1 %vm204_vm1, %v1021_v35  ;;  %1896 = vmatprep.mubr.msk.f32.mxu1 %vm2008_vm0, %v2007_v0 }
  0xaf   : > { %1822 = vmatmul.mubr.msk.f32.vlgmr.msra.gmra.mrb[0].mxu0 %vm200_vm3, %v1819_v40  ;;  %1899 = vmatprep.subr.mxu1 %v2007_v0  ;;  %v1355_v50 = vpop.permute.xlu0 %1354 }
  0xb0   : > { %1827 = vmatpush1.msk.msra.mxu0 %vm204_vm1, %v1023_v42  ;;  %1098 = vmatprep.mubr.f32.mxu0 %v2007_v0  ;;  %v1361_v54 = vsel %vm1360_vm9, %v1355_v50, %v1357_v45 }
  0xb1   : > { %1832 = vmatprep.subr.msk.mxu0 %vm204_vm1, %v1193_v43  ;;  %v1524_v56 = vpop.permute.xlu1 %1523 }
  0xb2   : > { %v1530_v58 = vsel %vm1529_vm10, %v1524_v56, %v1526_v53 }
  0xb3   : > { %v1528_v52 = vpop.permute.xlu0 %1527 }
  0xb4   : > { %v1531_v55 = vsel %vm1529_vm10, %v1526_v53, %v1528_v52 }
  0xb5   : > { %1897 = vmatmul.mubr.msk.f32.vlgmr.msra.gmra.mrb[0].mxu1 %vm200_vm3, %v1825_v46 }
  0xb6   : > { %1900 = vmatpush3.msk.msra.mxu1 %vm204_vm1, %v1190_v41  ;;  %1901 = vmatprep.mubr.msk.f32.mxu1 %vm2008_vm0, %v2007_v0 }
  0xb7   : > { %1828 = vmatmul.mubr.msk.f32.vlgmr.msra.gmra.mrb[0].mxu0 %vm200_vm3, %v1825_v46  ;;  %1904 = vmatprep.subr.mxu1 %v2007_v0 }
  0xb8   : > { %1833 = vmatpush1.msk.msra.mxu0 %vm204_vm1, %v1192_v48  ;;  %1267 = vmatprep.mubr.f32.mxu0 %v2007_v0 }
  0xb9   : > { %1838 = vmatprep.subr.msk.mxu0 %vm204_vm1, %v1362_v49 }
  0xbd   : > { %1902 = vmatmul.mubr.msk.f32.vlgmr.msra.gmra.mrb[0].mxu1 %vm200_vm3, %v1831_v51 }
  0xbe   : > { %1905 = vmatpush3.msk.msra.mxu1 %vm204_vm1, %v1359_v47  ;;  %1906 = vmatprep.mubr.msk.f32.mxu1 %vm2008_vm0, %v2007_v0 }
  0xbf   : > { %1834 = vmatmul.mubr.msk.f32.vlgmr.msra.gmra.mrb[0].mxu0 %vm200_vm3, %v1831_v51  ;;  %1909 = vmatprep.subr.mxu1 %v2007_v0 }
  0xc0   : > { %1839 = vmatpush1.msk.msra.mxu0 %vm204_vm1, %v1361_v54  ;;  %1436 = vmatprep.mubr.f32.mxu0 %v2007_v0 }
  0xc1   : > { %1844 = vmatprep.subr.msk.mxu0 %vm204_vm1, %v1531_v55 }
  0xc5   : > { %1907 = vmatmul.mubr.msk.f32.vlgmr.msra.gmra.mrb[0].mxu1 %vm200_vm3, %v1837_v57 }
  0xc6   : > { %1910 = vmatpush3.msk.msra.mxu1 %vm204_vm1, %v1528_v52  ;;  %1911 = vmatprep.mubr.msk.f32.mxu1 %vm2008_vm0, %v2007_v0 }
  0xc7   : > { %1840 = vmatmul.mubr.msk.f32.vlgmr.msra.gmra.mrb[0].mxu0 %vm200_vm3, %v1837_v57 }
  0xc8   : > { %1845 = vmatpush1.msk.msra.mxu0 %vm204_vm1, %v1530_v58  ;;  %1605 = vmatprep.mubr.f32.mxu0 %v2007_v0 }
  0xcd   : > { %1912 = vmatmul.mubr.msk.f32.vlgmr.msra.gmra.mrb[0].mxu1 %vm200_vm3, %v1843_v59 }
  0xcf   : > { %1846 = vmatmul.mubr.msk.f32.vlgmr.msra.gmra.mrb[0].mxu0 %vm200_vm3, %v1843_v59 }
 0x1a0   : > { %v1678_v60 = vpop.f32.mrb[0].mxu1 }
 0x1a1   : > { %1688 = vst.msk [vmem:[%s182_s22 + $0x10] sm:$0xff] %vm1687_vm11, %v1678_v60  ;;  %v1913_v61 = vpop.f32.mrb[1].mxu1 }
 0x1a2   : > { %v1607_v62 = vpop.f32.mrb[0].mxu0 }
 0x1a3   : > { %1685 = vst [vmem:[%s182_s22] sm:$0xff] %v1607_v62  ;;  %v1609_v63 = vpop.f32.mrb[1].mxu0 }
 0x1a4   : > { %1686 = vst [vmem:[%s182_s22 + $0x8] sm:$0xff] %v1609_v63 }
 0x1a5 PF: > { %s12_s11 = sadd.s32 1, %s2005_s11   ;;  %s2203_s9 = smov %s2001_s10 }
 0x1a6   : > { %p9_p5 = scmp.ge.s32.totalorder %s12_s11, 4   ;;  %s2204_s10 = smov %s2206_s12 }
 0x1a8   :  { %11 = sbr.rel (!%p9_p5) target bundleno = 2 (0x2), region = 69 }

</bundles_post_ra>
